<compile_context>
chip_gen: v6e
topology: v6e:2x2x1
jax: 0.10.0
libtpu: 0.0.40
codegen_flags: <defaults>
</compile_context>

<pallas_src>
import jax
import jax.numpy as jnp
from jax.experimental import pallas as pl
from jax.experimental.pallas import tpu as pltpu

IN_FEATURES = 784
HIDDEN = 256
OUT_FEATURES = 10

N_PAD = 128      # fc2 output padded to one full lane tile; slice [:, :10] outside
TM_MAX = 512     # max batch rows per grid step
MIN_SPLIT = 256  # only split small batches in two if each half is >= this


def mlp_kernel(x_ref, w1_ref, b1_ref, w2_ref, b2_ref, o_ref):
    # fc1: (tm, 784) @ (784, 256) on the MXU; x cast to bf16 in-kernel (weights
    # are already bf16), f32 accumulation.  Mosaic pads K=784 internally.
    h = jnp.dot(
        x_ref[...].astype(jnp.bfloat16),
        w1_ref[...],
        preferred_element_type=jnp.float32,
    )
    # Bias + ReLU in f32 on the VPU.
    h = jnp.maximum(h + b1_ref[...], 0.0)
    # fc2: (tm, 256) @ (256, 128) -> lane-dense (tm, 128) output block.
    out = jnp.dot(
        h.astype(jnp.bfloat16),
        w2_ref[...],
        preferred_element_type=jnp.float32,
    )
    o_ref[...] = (out + b2_ref[...]).astype(o_ref.dtype)


def _choose_tm(B, tm_max=TM_MAX):
    """Pick a batch tile that avoids padding copies of x when possible."""
    if B <= tm_max:
        # Split into two tiles when big enough so v7x's 2 TensorCores both get
        # work; otherwise a single full-extent tile (block dim == array dim is
        # always legal, so no padding is ever needed in this branch).
        if B >= 2 * MIN_SPLIT and B % 16 == 0:
            return B // 2
        return B
    if B % 8 == 0:
        # Largest multiple-of-8 divisor of B that fits in tm_max -> no padding.
        for tm in range(tm_max, 7, -8):
            if B % tm == 0:
                return tm
    return tm_max  # ragged batch: fall back to padding the last tile


def prepare_params(w1, b1, w2, b2):
    """One-time device-layout prep (call once, reuse across forward calls).

    w1: (784, 256) -> bf16                 (transpose of torch's (out, in))
    b1: (1, 256)   -> f32
    w2: (256, 10)  -> bf16, padded to (256, 128)
    b2: (1, 10)    -> f32,  padded to (1, 128)
    """
    w1_p = w1.astype(jnp.bfloat16)
    b1_p = jnp.reshape(b1, (1, HIDDEN)).astype(jnp.float32)
    w2_p = jnp.pad(w2, ((0, 0), (0, N_PAD - OUT_FEATURES))).astype(jnp.bfloat16)
    b2_p = jnp.pad(
        jnp.reshape(b2, (1, OUT_FEATURES)), ((0, 0), (0, N_PAD - OUT_FEATURES))
    ).astype(jnp.float32)
    return w1_p, b1_p, w2_p, b2_p


def torch_model_forward(x, w1_p, b1_p, w2_p, b2_p, *, tm_max=TM_MAX):
    """Forward pass of TorchModel.

    x: (B, 784) f32 (unpadded — no host-side K padding pass).
    (w1_p, b1_p, w2_p, b2_p) from prepare_params.
    returns (B, 10) f32.
    """
    B = x.shape[0]
    tm = _choose_tm(B, tm_max)
    n_tiles = pl.cdiv(B, tm)
    b_pad = n_tiles * tm
    # Only materialize a padded copy of x for ragged batches (rare path).
    x_in = x if b_pad == B else jnp.pad(x, ((0, b_pad - B), (0, 0)))

    flops = 2 * b_pad * (IN_FEATURES * HIDDEN + HIDDEN * N_PAD)
    bytes_accessed = (
        4 * b_pad * IN_FEATURES                          # x in (f32)
        + 2 * (IN_FEATURES * HIDDEN + HIDDEN * N_PAD)    # bf16 weights
        + 4 * (HIDDEN + N_PAD)                           # biases
        + 4 * b_pad * N_PAD                              # out (f32)
    )

    out_padded = pl.pallas_call(
        mlp_kernel,
        out_shape=jax.ShapeDtypeStruct((b_pad, N_PAD), jnp.float32),
        grid=(n_tiles,),
        in_specs=[
            pl.BlockSpec((tm, IN_FEATURES), lambda i: (i, 0)),      # x: one batch tile/step
            pl.BlockSpec((IN_FEATURES, HIDDEN), lambda i: (0, 0)),  # w1: VMEM-resident bf16
            pl.BlockSpec((1, HIDDEN), lambda i: (0, 0)),            # b1: resident
            pl.BlockSpec((HIDDEN, N_PAD), lambda i: (0, 0)),        # w2: resident bf16
            pl.BlockSpec((1, N_PAD), lambda i: (0, 0)),             # b2: resident
        ],
        out_specs=pl.BlockSpec((tm, N_PAD), lambda i: (i, 0)),
        compiler_params=pltpu.CompilerParams(
            dimension_semantics=("parallel",),   # megacore sharding on v7x
            vmem_limit_bytes=32 << 20,           # headroom for TM=512 on v5e too
        ),
        cost_estimate=pl.CostEstimate(
            flops=flops, transcendentals=0, bytes_accessed=bytes_accessed
        ),
    )(x_in, w1_p, b1_p, w2_p, b2_p)

    return out_padded[:B, :OUT_FEATURES]


def init_params(key):
    """Deterministic init mimicking torch.nn.Linear default (uniform +-1/sqrt(fan_in))."""
    k1, k2, k3, k4 = jax.random.split(key, 4)
    bound1 = 1.0 / (IN_FEATURES ** 0.5)
    bound2 = 1.0 / (HIDDEN ** 0.5)
    # Stored as (in, out) == transpose of torch's (out, in) weight layout.
    w1 = jax.random.uniform(k1, (IN_FEATURES, HIDDEN), jnp.float32, -bound1, bound1)
    b1 = jax.random.uniform(k2, (1, HIDDEN), jnp.float32, -bound1, bound1)
    w2 = jax.random.uniform(k3, (HIDDEN, OUT_FEATURES), jnp.float32, -bound2, bound2)
    b2 = jax.random.uniform(k4, (1, OUT_FEATURES), jnp.float32, -bound2, bound2)
    return w1, b1, w2, b2


if __name__ == "__main__":
    key = jax.random.PRNGKey(0)
    kx, kp = jax.random.split(key)

    B = 8  # small test batch; real workloads should batch >= 128 rows for MXU utilization
    x = jax.random.normal(kx, (B, IN_FEATURES), jnp.float32)
    w1, b1, w2, b2 = init_params(kp)
    params = prepare_params(w1, b1, w2, b2)

    out = torch_model_forward(x, *params)
    out = jax.block_until_ready(out)

    # Reference in plain f32 JAX (same math as the PyTorch forward).
    # Tolerance widened vs. pure-f32 because MXU inputs are bf16 (f32 accumulate).
    ref = jnp.maximum(x @ w1 + b1, 0.0) @ w2 + b2
    assert out.shape == (B, OUT_FEATURES)
    assert jnp.allclose(out, ref, atol=2e-2, rtol=2e-2)

    print("KERNEL_OK")
</pallas_src>

<mosaic_0001>
module attributes {stable_mosaic.version = 11 : i64} {
  func.func @mlp_kernel(%arg0: i32, %arg1: memref<8x784xf32, #tpu.memory_space<vmem>>, %arg2: memref<784x256xbf16, #tpu.memory_space<vmem>>, %arg3: memref<1x256xf32, #tpu.memory_space<vmem>>, %arg4: memref<256x128xbf16, #tpu.memory_space<vmem>>, %arg5: memref<1x128xf32, #tpu.memory_space<vmem>>, %arg6: memref<8x128xf32, #tpu.memory_space<vmem>>) attributes {dimension_semantics = [#tpu.dimension_semantics<parallel>], iteration_bounds = array<i64: 1>, scalar_prefetch = 0 : i64, scratch_operands = 0 : i64, tpu.core_type = #tpu.core_type<tc>, window_params = [{transform_indices = @transform_0, window_bounds = array<i64: 8, 784>}, {pipeline_mode = #tpu.pipeline_mode<synchronous>, transform_indices = @transform_1, window_bounds = array<i64: 784, 256>}, {pipeline_mode = #tpu.pipeline_mode<synchronous>, transform_indices = @transform_2, window_bounds = array<i64: 1, 256>}, {pipeline_mode = #tpu.pipeline_mode<synchronous>, transform_indices = @transform_3, window_bounds = array<i64: 256, 128>}, {pipeline_mode = #tpu.pipeline_mode<synchronous>, transform_indices = @transform_4, window_bounds = array<i64: 1, 128>}, {transform_indices = @transform_5, window_bounds = array<i64: 8, 128>}]} {
    %c0 = arith.constant 0 : index
    %c0_0 = arith.constant 0 : index
    %0 = vector.load %arg1[%c0, %c0_0] : memref<8x784xf32, #tpu.memory_space<vmem>>, vector<8x784xf32>
    %1 = arith.truncf %0 : vector<8x784xf32> to vector<8x784xbf16>
    %c0_1 = arith.constant 0 : index
    %c0_2 = arith.constant 0 : index
    %2 = vector.load %arg2[%c0_1, %c0_2] : memref<784x256xbf16, #tpu.memory_space<vmem>>, vector<784x256xbf16>
    %cst = arith.constant dense<0.000000e+00> : vector<8x256xf32>
    %3 = tpu.matmul %1, %2, %cst {dimension_numbers = #tpu.dot_dimension_numbers<[1], [0], [0], [1], [0, 0, 1, 1], [], []>} : vector<8x784xbf16>, vector<784x256xbf16>, vector<8x256xf32> -> vector<8x256xf32>
    %c0_3 = arith.constant 0 : index
    %c0_4 = arith.constant 0 : index
    %4 = vector.load %arg3[%c0_3, %c0_4] : memref<1x256xf32, #tpu.memory_space<vmem>>, vector<1x256xf32>
    %5 = vector.broadcast %4 : vector<1x256xf32> to vector<8x256xf32>
    %6 = arith.addf %3, %5 : vector<8x256xf32>
    %cst_5 = arith.constant 0.000000e+00 : f32
    %7 = vector.broadcast %cst_5 : f32 to vector<8x256xf32>
    %8 = arith.maximumf %6, %7 : vector<8x256xf32>
    %9 = arith.truncf %8 : vector<8x256xf32> to vector<8x256xbf16>
    %c0_6 = arith.constant 0 : index
    %c0_7 = arith.constant 0 : index
    %10 = vector.load %arg4[%c0_6, %c0_7] : memref<256x128xbf16, #tpu.memory_space<vmem>>, vector<256x128xbf16>
    %cst_8 = arith.constant dense<0.000000e+00> : vector<8x128xf32>
    %11 = tpu.matmul %9, %10, %cst_8 {dimension_numbers = #tpu.dot_dimension_numbers<[1], [0], [0], [1], [0, 0, 1, 1], [], []>} : vector<8x256xbf16>, vector<256x128xbf16>, vector<8x128xf32> -> vector<8x128xf32>
    %c0_9 = arith.constant 0 : index
    %c0_10 = arith.constant 0 : index
    %12 = vector.load %arg5[%c0_9, %c0_10] : memref<1x128xf32, #tpu.memory_space<vmem>>, vector<1x128xf32>
    %13 = vector.broadcast %12 : vector<1x128xf32> to vector<8x128xf32>
    %14 = arith.addf %11, %13 : vector<8x128xf32>
    %c0_11 = arith.constant 0 : index
    %c0_12 = arith.constant 0 : index
    %15 = vector.load %arg6[%c0_11, %c0_12] : memref<8x128xf32, #tpu.memory_space<vmem>>, vector<8x128xf32>
    tpu.vector_store %arg6[%c0_11, %c0_12], %14 {strides = array<i32>} : memref<8x128xf32, #tpu.memory_space<vmem>>, vector<8x128xf32>,
    return
  }
  func.func @transform_0(%arg0: i32) -> (i32, i32) {
    %c0_i32 = arith.constant 0 : i32
    %c0_i32_0 = arith.constant 0 : i32
    return %arg0, %c0_i32 : i32, i32
  }
  func.func @transform_1(%arg0: i32) -> (i32, i32) {
    %c0_i32 = arith.constant 0 : i32
    %c0_i32_0 = arith.constant 0 : i32
    %c0_i32_1 = arith.constant 0 : i32
    return %c0_i32, %c0_i32_0 : i32, i32
  }
  func.func @transform_2(%arg0: i32) -> (i32, i32) {
    %c0_i32 = arith.constant 0 : i32
    %c0_i32_0 = arith.constant 0 : i32
    %c0_i32_1 = arith.constant 0 : i32
    return %c0_i32, %c0_i32_0 : i32, i32
  }
  func.func @transform_3(%arg0: i32) -> (i32, i32) {
    %c0_i32 = arith.constant 0 : i32
    %c0_i32_0 = arith.constant 0 : i32
    %c0_i32_1 = arith.constant 0 : i32
    return %c0_i32, %c0_i32_0 : i32, i32
  }
  func.func @transform_4(%arg0: i32) -> (i32, i32) {
    %c0_i32 = arith.constant 0 : i32
    %c0_i32_0 = arith.constant 0 : i32
    %c0_i32_1 = arith.constant 0 : i32
    return %c0_i32, %c0_i32_0 : i32, i32
  }
  func.func @transform_5(%arg0: i32) -> (i32, i32) {
    %c0_i32 = arith.constant 0 : i32
    %c0_i32_0 = arith.constant 0 : i32
    return %arg0, %c0_i32 : i32, i32
  }
}

</mosaic_0001>

<bundles_post_ra>
// kernel: tpu_custom_call.1
= control target key start
LH: loop header
LB: loop body
LE: loop exit
PB: predicated region body
PF: predicated region fallthrough
CT: control target
= control target key end

     0   :  { %10 = vsyncpa [#allocation3], 0  ;;  %s1493_s0 = inlined_call_operand.hbm [shape: f32[8,784], index: 0, kind: input, shape index: {}]   ;;  %s1494_s1 = inlined_call_operand.hbm [shape: bf16[784,256], index: 1, kind: input, shape index: {}]   ;;  %s1495_s2 = inlined_call_operand.vmem [shape: f32[1,256], index: 2, kind: input, shape index: {}]   ;;  %s1496_s3 = inlined_call_operand.hbm [shape: bf16[256,128], index: 3, kind: input, shape index: {}]   ;;  %s1497_s4 = inlined_call_operand.vmem [shape: f32[1,128], index: 4, kind: input, shape index: {}]   ;;  %s1498_s5 = inlined_call_operand.hbm [shape: f32[8,128], index: 5, kind: output, shape index: {}]  }
   0x1   :  { %11 = vsyncpa [#allocation6], 0 }
   0x2   :  { %12 = vsyncpa [#allocation4], 0  ;;  %s1435_s18 = smov [#allocation5]  }
   0x3   :  { %s28_s19 = sshll.u32 %s1435_s18, 4  ;;  %s29_s19 = int_to_ptr.vmem [resolvable:$true] %s28_s19 }
   0x4   :  { %s1357_s20 = scalar_lea.vmem %s29_s19, 12544  ;;  %p1362_p1 = scmp.lt.s32.totalorder %s29_s19, %s29_s19 }
   0x5   :  { %p1358_p0 = scmp.ne.s32.totalorder %s29_s19, %s1357_s20  ;;  %p1363_p2 = scmp.lt.s32.totalorder %s1357_s20, %s1357_s20 }
   0x7   :  { %p1364_p3 = por %p1363_p2, %p1362_p1 }
   0x9   :  { %p1365_p4 = pnand %p1364_p3, %p1358_p0 }
   0xb   :  { %1368 = shalt.err (!%p1365_p4)
}
   0xc   :  { %s1436_s21 = smov 128   ;;  %s1437_s22 = smov 8  }
   0xd   :  { %34 = dma.hbm_to_vmem [thread:$0]  %s1494_s1, 12544, %s29_s19, [#allocation6], %s1436_s21, %s1436_s21, %s1437_s22  }
   0xe   :  { %s1438_s25 = smov [#allocation2]   ;;  %s1439_s27 = smov [#allocation7]  }
   0xf   :  { %s19_s26 = sshll.u32 %s1438_s25, 4  ;;  %s42_s28 = sshll.u32 %s1439_s27, 4  ;;  %s20_s26 = int_to_ptr.vmem [resolvable:$true] %s19_s26  ;;  %s43_s28 = int_to_ptr.vmem [resolvable:$true] %s42_s28 }
  0x10   :  { %s1377_s29 = scalar_lea.vmem %s20_s26, 896  ;;  %p1382_p6 = scmp.lt.s32.totalorder %s20_s26, %s20_s26 }
  0x11   :  { %p1378_p5 = scmp.ne.s32.totalorder %s20_s26, %s1377_s29  ;;  %p1383_p7 = scmp.lt.s32.totalorder %s1377_s29, %s1377_s29 }
  0x13   :  { %p1384_p8 = por %p1383_p7, %p1382_p6 }
  0x15   :  { %p1385_p9 = pnand %p1384_p8, %p1378_p5 }
  0x17   :  { %1388 = shalt.err (!%p1385_p9)
}
  0x18   :  { %22 = dma.hbm_to_vmem [thread:$0]  %s1493_s0, 896, %s20_s26, [#allocation3]  }
  0x19   :  { %s1397_s7 = scalar_lea.vmem %s43_s28, 2048  ;;  %p1402_p11 = scmp.lt.s32.totalorder %s43_s28, %s43_s28 }
  0x1a   :  { %p1398_p10 = scmp.ne.s32.totalorder %s43_s28, %s1397_s7  ;;  %p1403_p12 = scmp.lt.s32.totalorder %s1397_s7, %s1397_s7 }
  0x1c   :  { %p1404_p13 = por %p1403_p12, %p1402_p11 }
  0x1e   :  { %p1405_p0 = pnand %p1404_p13, %p1398_p10 }
  0x20   :  { %1408 = shalt.err (!%p1405_p0)
}
  0x21   :  { %s1440_s1 = smov 64   ;;  %s1441_s8 = smov 4  }
  0x22   :  { %48 = dma.hbm_to_vmem [thread:$0]  %s1496_s3, 2048, %s43_s28, [#allocation6], %s1440_s1, %s1440_s1, %s1441_s8  }
  0x23   :  { %1429 = dma.done.wait [#allocation3], 896  }
  0x24   :  { %1430 = vsyncadd [#allocation3], 4294966400 }
  0x25   :  { %1431 = dma.done.wait [#allocation6], 14592  }
  0x26   :  { %1432 = vsyncadd [#allocation6], 4294952704  ;;  %v1186_v0 = vld [vmem:[#allocation5 + $0x74] ss:$8 sps:$4 sm:$0xff]   ;;  %v1188_v1 = vld [vmem:[#allocation5 + $0x70] ss:$8 sps:$4 sm:$0xff]  }
  0x27   :  { %679 = vmatprep.subr.bf16.mxu0 %v1186_v0  ;;  %v1189_v2 = vld [vmem:[#allocation5 + $0x174] ss:$8 sps:$4 sm:$0xff]   ;;  %v1191_v3 = vld [vmem:[#allocation5 + $0x170] ss:$8 sps:$4 sm:$0xff]   ;;  %v1192_v4 = vld [vmem:[#allocation5 + $0x64] ss:$8 sps:$4 sm:$0xff]  }
  0x28   :  { %680 = vmatpush1.bf16.msra.mxu0 %v1188_v1  ;;  %v1194_v5 = vld [vmem:[#allocation5 + $0x60] ss:$8 sps:$4 sm:$0xff]   ;;  %720 = vmatprep.subr.bf16.mxu1 %v1189_v2  ;;  %v1195_v6 = vld [vmem:[#allocation5 + $0x164] ss:$8 sps:$4 sm:$0xff]   ;;  %v1198_v8 = vld [vmem:[#allocation5 + $0x54] ss:$8 sps:$4 sm:$0xff]  }
  0x29   :  { %721 = vmatpush1.bf16.msra.mxu1 %v1191_v3  ;;  %681 = vmatprep.subr.bf16.mxu0 %v1192_v4  ;;  %v1197_v7 = vld [vmem:[#allocation5 + $0x160] ss:$8 sps:$4 sm:$0xff]   ;;  %v1200_v9 = vld [vmem:[#allocation5 + $0x50] ss:$8 sps:$4 sm:$0xff]   ;;  %v1201_v10 = vld [vmem:[#allocation5 + $0x154] ss:$8 sps:$4 sm:$0xff]  }
  0x2a   :  { %722 = vmatprep.subr.bf16.mxu1 %v1195_v6  ;;  %v1204_v11 = vld [vmem:[#allocation5 + $0x44] ss:$8 sps:$4 sm:$0xff]   ;;  %v1203_v12 = vld [vmem:[#allocation5 + $0x150] ss:$8 sps:$4 sm:$0xff]   ;;  %v1206_v14 = vld [vmem:[#allocation5 + $0x40] ss:$8 sps:$4 sm:$0xff]  }
  0x2b   :  { %v1207_v13 = vld [vmem:[#allocation5 + $0x144] ss:$8 sps:$4 sm:$0xff]   ;;  %v1210_v15 = vld [vmem:[#allocation5 + $0x34] ss:$8 sps:$4 sm:$0xff]   ;;  %v1209_v16 = vld [vmem:[#allocation5 + $0x140] ss:$8 sps:$4 sm:$0xff]  }
  0x2c   :  { %682 = vmatpush1.bf16.msra.mxu0 %v1194_v5  ;;  %v1213_v17 = vld [vmem:[#allocation5 + $0x134] ss:$8 sps:$4 sm:$0xff]   ;;  %v1212_v18 = vld [vmem:[#allocation5 + $0x30] ss:$8 sps:$4 sm:$0xff]   ;;  %v1216_v19 = vld [vmem:[#allocation5 + $0x24] ss:$8 sps:$4 sm:$0xff]  }
  0x2d   :  { %683 = vmatprep.subr.bf16.mxu0 %v1198_v8  ;;  %723 = vmatpush1.bf16.msra.mxu1 %v1197_v7  ;;  %v1215_v20 = vld [vmem:[#allocation5 + $0x130] ss:$8 sps:$4 sm:$0xff]   ;;  %v1219_v21 = vld [vmem:[#allocation5 + $0x124] ss:$8 sps:$4 sm:$0xff]   ;;  %v1218_v22 = vld [vmem:[#allocation5 + $0x20] ss:$8 sps:$4 sm:$0xff]  }
  0x2e   :  { %724 = vmatprep.subr.bf16.mxu1 %v1201_v10  ;;  %v1222_v23 = vld [vmem:[#allocation5 + $0x14] ss:$8 sps:$4 sm:$0xff]   ;;  %v1221_v24 = vld [vmem:[#allocation5 + $0x120] ss:$8 sps:$4 sm:$0xff]   ;;  %v1224_v26 = vld [vmem:[#allocation5 + $0x10] ss:$8 sps:$4 sm:$0xff]  }
  0x2f   :  { %v1225_v25 = vld [vmem:[#allocation5 + $0x114] ss:$8 sps:$4 sm:$0xff]   ;;  %v1228_v27 = vld [vmem:[#allocation5 + $0x4] ss:$8 sps:$4 sm:$0xff]   ;;  %v1227_v28 = vld [vmem:[#allocation5 + $0x110] ss:$8 sps:$4 sm:$0xff]  }
  0x30   :  { %684 = vmatpush1.bf16.msra.mxu0 %v1200_v9  ;;  %v1231_v29 = vld [vmem:[#allocation5 + $0x104] ss:$8 sps:$4 sm:$0xff]   ;;  %v1230_v30 = vld [vmem:[#allocation5] ss:$8 sps:$4 sm:$0xff]   ;;  %v1234_v31 = vld [vmem:[#allocation5 + $0xf4] ss:$8 sps:$4 sm:$0xff]  }
  0x31   :  { %685 = vmatprep.subr.bf16.mxu0 %v1204_v11  ;;  %725 = vmatpush1.bf16.msra.mxu1 %v1203_v12  ;;  %v1233_v32 = vld [vmem:[#allocation5 + $0x100] ss:$8 sps:$4 sm:$0xff]   ;;  %v1237_v33 = vld [vmem:[#allocation5 + $0x1f4] ss:$8 sps:$4 sm:$0xff]   ;;  %v1236_v34 = vld [vmem:[#allocation5 + $0xf0] ss:$8 sps:$4 sm:$0xff]  }
  0x32   :  { %726 = vmatprep.subr.bf16.mxu1 %v1207_v13  ;;  %v1240_v35 = vld [vmem:[#allocation5 + $0xe4] ss:$8 sps:$4 sm:$0xff]   ;;  %v1239_v36 = vld [vmem:[#allocation5 + $0x1f0] ss:$8 sps:$4 sm:$0xff]   ;;  %v1242_v38 = vld [vmem:[#allocation5 + $0xe0] ss:$8 sps:$4 sm:$0xff]  }
  0x33   :  { %v1243_v37 = vld [vmem:[#allocation5 + $0x1e4] ss:$8 sps:$4 sm:$0xff]   ;;  %v1246_v39 = vld [vmem:[#allocation5 + $0xd4] ss:$8 sps:$4 sm:$0xff]   ;;  %v1245_v40 = vld [vmem:[#allocation5 + $0x1e0] ss:$8 sps:$4 sm:$0xff]  }
  0x34   :  { %686 = vmatpush1.bf16.msra.mxu0 %v1206_v14  ;;  %v1249_v41 = vld [vmem:[#allocation5 + $0x1d4] ss:$8 sps:$4 sm:$0xff]   ;;  %v1248_v42 = vld [vmem:[#allocation5 + $0xd0] ss:$8 sps:$4 sm:$0xff]   ;;  %v1252_v43 = vld [vmem:[#allocation5 + $0xc4] ss:$8 sps:$4 sm:$0xff]  }
  0x35   :  { %687 = vmatprep.subr.bf16.mxu0 %v1210_v15  ;;  %727 = vmatpush1.bf16.msra.mxu1 %v1209_v16  ;;  %v1251_v44 = vld [vmem:[#allocation5 + $0x1d0] ss:$8 sps:$4 sm:$0xff]   ;;  %v1255_v45 = vld [vmem:[#allocation5 + $0x1c4] ss:$8 sps:$4 sm:$0xff]   ;;  %v1254_v47 = vld [vmem:[#allocation5 + $0xc0] ss:$8 sps:$4 sm:$0xff]  }
  0x36   :  { %728 = vmatprep.subr.bf16.mxu1 %v1213_v17  ;;  %v62_v46 = vld [vmem:[#allocation2 + $0x8] sm:$0xff]  ;;  %v64_v50 = vld [vmem:[#allocation2 + $0x18] sm:$0xff]  ;;  %v61_v4 = vld [vmem:[#allocation2] sm:$0xff]  ;;  %vm675_vm0 = vcmask 130048   ;;  %s1443_s12 = smov [#allocation8]  }
  0x37   :  { %v69_v48 = vpack.c.bf16 %v62_v46, %v62_v46  ;;  %v1258_v49 = vld [vmem:[#allocation5 + $0xb4] ss:$8 sps:$4 sm:$0xff]   ;;  %v1257_v51 = vld [vmem:[#allocation5 + $0x1c0] ss:$8 sps:$4 sm:$0xff]   ;;  %v71_v52 = vpack.c.bf16 %v64_v50, %v64_v50  ;;  %v1260_v54 = vld [vmem:[#allocation5 + $0xb0] ss:$8 sps:$4 sm:$0xff]   ;;  %v68_v7 = vpack.c.bf16 %v61_v4, %v61_v4 }
  0x38   :  { %688 = vmatpush1.bf16.msra.mxu0 %v1212_v18  ;;  %v1261_v53 = vld [vmem:[#allocation5 + $0x1b4] ss:$8 sps:$4 sm:$0xff]   ;;  %v1264_v55 = vld [vmem:[#allocation5 + $0xa4] ss:$8 sps:$4 sm:$0xff]   ;;  %v1263_v56 = vld [vmem:[#allocation5 + $0x1b0] ss:$8 sps:$4 sm:$0xff]  }
  0x39   :  { %689 = vmatprep.subr.bf16.mxu0 %v1216_v19  ;;  %729 = vmatpush1.bf16.msra.mxu1 %v1215_v20  ;;  %v1267_v57 = vld [vmem:[#allocation5 + $0x1a4] ss:$8 sps:$4 sm:$0xff]   ;;  %v1266_v58 = vld [vmem:[#allocation5 + $0xa0] ss:$8 sps:$4 sm:$0xff]   ;;  %v1270_v59 = vld [vmem:[#allocation5 + $0x94] ss:$8 sps:$4 sm:$0xff]  }
  0x3a   :  { %730 = vmatprep.subr.bf16.mxu1 %v1219_v21  ;;  %711 = vmatprep.mubr.bf16.mxu0 %v69_v48  ;;  %v1269_v60 = vld [vmem:[#allocation5 + $0x1a0] ss:$8 sps:$4 sm:$0xff]   ;;  %v1273_v61 = vld [vmem:[#allocation5 + $0x194] ss:$8 sps:$4 sm:$0xff]   ;;  %v1272_v62 = vld [vmem:[#allocation5 + $0x90] ss:$8 sps:$4 sm:$0xff]  }
  0x3b   :  { %752 = vmatprep.mubr.bf16.mxu1 %v71_v52  ;;  %v1276_v63 = vld [vmem:[#allocation5 + $0x84] ss:$8 sps:$4 sm:$0xff]   ;;  %v1275_v0 = vld [vmem:[#allocation5 + $0x190] ss:$8 sps:$4 sm:$0xff]   ;;  %v1278_v1 = vld [vmem:[#allocation5 + $0x80] ss:$8 sps:$4 sm:$0xff]  }
  0x3c   :  { %690 = vmatpush1.bf16.msra.mxu0 %v1218_v22  ;;  %v1279_v2 = vld [vmem:[#allocation5 + $0x184] ss:$8 sps:$4 sm:$0xff]   ;;  %v1281_v3 = vld [vmem:[#allocation5 + $0x180] ss:$8 sps:$4 sm:$0xff]   ;;  %v1284_v5 = vld [vmem:[#allocation5 + $0x274] ss:$8 sps:$4 sm:$0xff]  }
  0x3d   :  { %691 = vmatprep.subr.bf16.mxu0 %v1222_v23  ;;  %731 = vmatpush1.bf16.msra.mxu1 %v1221_v24  ;;  %v63_v6 = vld [vmem:[#allocation2 + $0x10] sm:$0xff]  ;;  %v1287_v9 = vld [vmem:[#allocation5 + $0x264] ss:$8 sps:$4 sm:$0xff]   ;;  %v1327_v11 = vld [vmem:[#allocation5 + $0x300] ss:$8 sps:$4 sm:$0xff]   ;;  %v1442_v19 = vmov 0  }
  0x3e   :  { %732 = vmatprep.subr.bf16.mxu1 %v1225_v25  ;;  %v1282_v8 = vld [vmem:[#allocation5 + $0x270] ss:$8 sps:$4 sm:$0xff]   ;;  %v70_v10 = vpack.c.bf16 %v63_v6, %v63_v6  ;;  %v1329_v12 = vld [vmem:[#allocation5 + $0x304] ss:$8 sps:$4 sm:$0xff]   ;;  %v1285_v13 = vld [vmem:[#allocation5 + $0x260] ss:$8 sps:$4 sm:$0xff]  }
  0x3f   :  { %v1290_v14 = vld [vmem:[#allocation5 + $0x254] ss:$8 sps:$4 sm:$0xff]   ;;  %v1288_v18 = vld [vmem:[#allocation5 + $0x250] ss:$8 sps:$4 sm:$0xff]   ;;  %v1293_v20 = vld [vmem:[#allocation5 + $0x244] ss:$8 sps:$4 sm:$0xff]  }
  0x40   :  { %692 = vmatpush1.bf16.msra.mxu0 %v1224_v26  ;;  %v67_v15 = vld [vmem:[#allocation2 + $0x30] sm:$0xff]  ;;  %v66_v16 = vld [vmem:[#allocation2 + $0x28] sm:$0xff]  ;;  %v1291_v22 = vld [vmem:[#allocation5 + $0x240] ss:$8 sps:$4 sm:$0xff]   ;;  %s1029_s13 = sshll.u32 %s1443_s12, 4  ;;  %s1030_s13 = int_to_ptr.vmem [resolvable:$true] %s1029_s13 }
  0x41   :  { %693 = vmatprep.subr.bf16.mxu0 %v1228_v27  ;;  %733 = vmatpush1.bf16.msra.mxu1 %v1227_v28  ;;  %v73_v17 = vpack.c.bf16 %v66_v16, %v66_v16  ;;  %v74_v21 = vpack.c.bf16 %v67_v15, %v67_v15  ;;  %v1296_v23 = vld [vmem:[#allocation5 + $0x234] ss:$8 sps:$4 sm:$0xff]   ;;  %v1294_v24 = vld [vmem:[#allocation5 + $0x230] ss:$8 sps:$4 sm:$0xff]   ;;  %v1299_v25 = vld [vmem:[#allocation5 + $0x224] ss:$8 sps:$4 sm:$0xff]   ;;  %p1414_p2 = scmp.lt.s32.totalorder %s1030_s13, %s1030_s13 }
  0x42   :  { %734 = vmatprep.subr.bf16.mxu1 %v1231_v29  ;;  %v1297_v26 = vld [vmem:[#allocation5 + $0x220] ss:$8 sps:$4 sm:$0xff]   ;;  %v1302_v27 = vld [vmem:[#allocation5 + $0x214] ss:$8 sps:$4 sm:$0xff]   ;;  %v1300_v28 = vld [vmem:[#allocation5 + $0x210] ss:$8 sps:$4 sm:$0xff]  }
  0x43   :  { %v1305_v29 = vld [vmem:[#allocation5 + $0x204] ss:$8 sps:$4 sm:$0xff]   ;;  %v1330_v46 = vld [vmem:[#allocation5 + $0x280] ss:$8 sps:$4 sm:$0xff]   ;;  %s1409_s14 = scalar_lea.vmem %s1030_s13, 128 }
  0x44   :  { %694 = vmatpush1.bf16.msra.mxu0 %v1230_v30  ;;  %v1303_v30 = vld [vmem:[#allocation5 + $0x200] ss:$8 sps:$4 sm:$0xff]   ;;  %p1410_p1 = scmp.ne.s32.totalorder %s1030_s13, %s1409_s14  ;;  %p1415_p3 = scmp.lt.s32.totalorder %s1409_s14, %s1409_s14 }
  0x45   :  { %695 = vmatprep.subr.bf16.mxu0 %v1234_v31  ;;  %735 = vmatpush1.bf16.msra.mxu1 %v1233_v32  ;;  %v1308_v31 = vld [vmem:[#allocation5 + $0x2f4] ss:$8 sps:$4 sm:$0xff]   ;;  %v1306_v32 = vld [vmem:[#allocation5 + $0x2f0] ss:$8 sps:$4 sm:$0xff]   ;;  %v1334_v50 = vld [vmem:[#allocation7 + $0x38] sm:$0xff]  }
  0x46   :  { %736 = vmatprep.subr.bf16.mxu1 %v1237_v33  ;;  %v1311_v33 = vld [vmem:[#allocation5 + $0x2e4] ss:$8 sps:$4 sm:$0xff]   ;;  %v173_v16 = vld [vmem:[%s1495_s2] sm:$0x3]  ;;  %p1416_p4 = por %p1415_p3, %p1414_p2 }
  0x47   :  { %v1336_v52 = vld [vmem:[#allocation7 + $0x30] sm:$0xff]  }
  0x48   :  { %696 = vmatpush2.bf16.msra.mxu0 %v1236_v34  ;;  %v1309_v34 = vld [vmem:[#allocation5 + $0x2e0] ss:$8 sps:$4 sm:$0xff]   ;;  %p1417_p5 = pnand %p1416_p4, %p1410_p1 }
  0x49   :  { %697 = vmatprep.subr.bf16.mxu0 %v1240_v35  ;;  %737 = vmatpush2.bf16.msra.mxu1 %v1239_v36  ;;  %v1314_v35 = vld [vmem:[#allocation5 + $0x2d4] ss:$8 sps:$4 sm:$0xff]   ;;  %v1312_v36 = vld [vmem:[#allocation5 + $0x2d0] ss:$8 sps:$4 sm:$0xff]  }
  0x4a   :  { %738 = vmatprep.subr.bf16.mxu1 %v1243_v37  ;;  %v1317_v37 = vld [vmem:[#allocation5 + $0x2c4] ss:$8 sps:$4 sm:$0xff]  }
  0x4c   :  { %698 = vmatpush2.bf16.msra.mxu0 %v1242_v38  ;;  %v1315_v38 = vld [vmem:[#allocation5 + $0x2c0] ss:$8 sps:$4 sm:$0xff]  }
  0x4d   :  { %699 = vmatprep.subr.bf16.mxu0 %v1246_v39  ;;  %739 = vmatpush2.bf16.msra.mxu1 %v1245_v40  ;;  %v1320_v39 = vld [vmem:[#allocation5 + $0x2b4] ss:$8 sps:$4 sm:$0xff]   ;;  %v1318_v40 = vld [vmem:[#allocation5 + $0x2b0] ss:$8 sps:$4 sm:$0xff]  }
  0x4e   :  { %740 = vmatprep.subr.bf16.mxu1 %v1249_v41  ;;  %v1323_v41 = vld [vmem:[#allocation5 + $0x2a4] ss:$8 sps:$4 sm:$0xff]  }
  0x50   :  { %700 = vmatpush2.bf16.msra.mxu0 %v1248_v42  ;;  %v1321_v42 = vld [vmem:[#allocation5 + $0x2a0] ss:$8 sps:$4 sm:$0xff]  }
  0x51   :  { %701 = vmatprep.subr.bf16.mxu0 %v1252_v43  ;;  %741 = vmatpush2.bf16.msra.mxu1 %v1251_v44  ;;  %v1326_v43 = vld [vmem:[#allocation5 + $0x294] ss:$8 sps:$4 sm:$0xff]   ;;  %v1324_v44 = vld [vmem:[#allocation5 + $0x290] ss:$8 sps:$4 sm:$0xff]  }
  0x52   :  { %742 = vmatprep.subr.bf16.mxu1 %v1255_v45  ;;  %v1332_v45 = vld [vmem:[#allocation5 + $0x284] ss:$8 sps:$4 sm:$0xff]  }
  0x54   :  { %702 = vmatpush2.bf16.msra.mxu0 %v1254_v47  ;;  %v65_v47 = vld [vmem:[#allocation2 + $0x20] sm:$0xff] }
  0x55   :  { %703 = vmatprep.subr.bf16.mxu0 %v1258_v49  ;;  %743 = vmatpush2.bf16.msra.mxu1 %v1257_v51  ;;  %v72_v48 = vpack.c.bf16 %v65_v47, %v65_v47  ;;  %v1333_v49 = vld [vmem:[#allocation7 + $0x78] sm:$0xff]   ;;  %v1335_v51 = vld [vmem:[#allocation7 + $0x70] sm:$0xff]  }
  0x56   :  { %744 = vmatprep.subr.bf16.mxu1 %v1261_v53  ;;  %v1337_v53 = vld [vmem:[#allocation7 + $0x68] sm:$0xff]  }
  0x58   :  { %704 = vmatpush2.bf16.msra.mxu0 %v1260_v54  ;;  %v1338_v54 = vld [vmem:[#allocation7 + $0x28] sm:$0xff]  }
  0x59   :  { %705 = vmatprep.subr.bf16.mxu0 %v1264_v55  ;;  %745 = vmatpush2.bf16.msra.mxu1 %v1263_v56  ;;  %v1339_v55 = vld [vmem:[#allocation7 + $0x60] sm:$0xff]  }
  0x5a   :  { %746 = vmatprep.subr.bf16.mxu1 %v1267_v57  ;;  %v1340_v56 = vld [vmem:[#allocation7 + $0x20] sm:$0xff]   ;;  %v1341_v57 = vld [vmem:[#allocation7 + $0x58] sm:$0xff]  }
  0x5c   :  { %706 = vmatpush2.bf16.msra.mxu0 %v1266_v58  ;;  %v1342_v58 = vld [vmem:[#allocation7 + $0x18] sm:$0xff]  }
  0x5d   :  { %707 = vmatprep.subr.bf16.mxu0 %v1270_v59  ;;  %747 = vmatpush2.bf16.msra.mxu1 %v1269_v60  ;;  %v1343_v59 = vld [vmem:[#allocation7 + $0x50] sm:$0xff]  }
  0x5e   :  { %748 = vmatprep.subr.bf16.mxu1 %v1273_v61  ;;  %v1344_v60 = vld [vmem:[#allocation7 + $0x10] sm:$0xff]   ;;  %v1345_v61 = vld [vmem:[#allocation7 + $0x48] sm:$0xff]  }
  0x60   :  { %708 = vmatpush2.bf16.msra.mxu0 %v1272_v62  ;;  %v1346_v62 = vld [vmem:[#allocation7 + $0x8] sm:$0xff]  }
  0x61   :  { %709 = vmatprep.subr.bf16.mxu0 %v1276_v63  ;;  %749 = vmatpush2.bf16.msra.mxu1 %v1275_v0  ;;  %v1347_v63 = vld [vmem:[#allocation7 + $0x40] sm:$0xff]  }
  0x62   :  { %750 = vmatprep.subr.bf16.mxu1 %v1279_v2  ;;  %v1348_v0 = vld [vmem:[#allocation7] sm:$0xff]  }
  0x64   :  { %710 = vmatpush2.bf16.msra.mxu0 %v1278_v1 }
  0x65   :  { %761 = vmatprep.subr.bf16.mxu0 %v1284_v5  ;;  %751 = vmatpush2.bf16.msra.mxu1 %v1281_v3 }
  0x66   :  { %816 = vmatprep.subr.bf16.mxu1 %v1329_v12 }
  0x67   :  { %712 = vmatmul.mubr.bf16.vlgmr.msra.gmra.mxu0 %v68_v7 }
  0x68   :  { %762 = vmatpush1.bf16.msra.mxu0 %v1282_v8  ;;  %753 = vmatmul.mubr.bf16.vlgmr.msra.gmra.mxu1 %v70_v10 }
  0x69   :  { %763 = vmatprep.subr.bf16.mxu0 %v1287_v9  ;;  %817 = vmatpush1.bf16.msra.mxu1 %v1327_v11 }
  0x6a   :  { %834 = vmatprep.mubr.bf16.mxu1 %v1442_v19  ;;  %793 = vmatprep.mubr.bf16.mxu0 %v73_v17 }
  0x6b   :  { %1155 = vmatprep.subr.bf16.mxu1 %v1333_v49 }
  0x6c   :  { %764 = vmatpush1.bf16.msra.mxu0 %v1285_v13  ;;  %v175_v13 = vlaneseq }
  0x6d   :  { %765 = vmatprep.subr.bf16.mxu0 %v1290_v14 }
  0x6e   :  { %v176_v14 = vshrl.u32 %v175_v13, 7 }
  0x70   :  { %766 = vmatpush1.bf16.msra.mxu0 %v1288_v18  ;;  %1137 = vmatmul.mubr.msk.bf16.vlgmr.msra.gmra.mxu1 %vm675_vm0, %v74_v21  ;;  %v177_v15 = vsub.s32 0, %v176_v14  ;;  %v181_v17 = vsub.s32 1, %v176_v14 }
  0x71   :  { %767 = vmatprep.subr.bf16.mxu0 %v1293_v20  ;;  %1156 = vmatpush3.bf16.msra.mxu1 %v1334_v50 }
  0x72   :  { %1157 = vmatprep.subr.bf16.mxu1 %v1335_v51  ;;  %v178_v18 = vrot.slane %v173_v16, %v177_v15  ;;  %v182_v19 = vrot.slane %v173_v16, %v181_v17 }
  0x74   :  { %768 = vmatpush1.bf16.msra.mxu0 %v1291_v22 }
  0x75   :  { %769 = vmatprep.subr.bf16.mxu0 %v1296_v23  ;;  %1158 = vmatpush3.bf16.msra.mxu1 %v1336_v52 }
  0x76   :  { %1159 = vmatprep.subr.bf16.mxu1 %v1337_v53 }
  0x78   :  { %770 = vmatpush1.bf16.msra.mxu0 %v1294_v24 }
  0x79   :  { %771 = vmatprep.subr.bf16.mxu0 %v1299_v25  ;;  %1160 = vmatpush3.bf16.msra.mxu1 %v1338_v54 }
  0x7a   :  { %1161 = vmatprep.subr.bf16.mxu1 %v1339_v55 }
  0x7c   :  { %772 = vmatpush1.bf16.msra.mxu0 %v1297_v26 }
  0x7d   :  { %773 = vmatprep.subr.bf16.mxu0 %v1302_v27  ;;  %1162 = vmatpush3.bf16.msra.mxu1 %v1340_v56 }
  0x7e   :  { %1163 = vmatprep.subr.bf16.mxu1 %v1341_v57 }
  0x80   :  { %774 = vmatpush1.bf16.msra.mxu0 %v1300_v28 }
  0x81   :  { %775 = vmatprep.subr.bf16.mxu0 %v1305_v29  ;;  %1164 = vmatpush3.bf16.msra.mxu1 %v1342_v58 }
  0x82   :  { %1165 = vmatprep.subr.bf16.mxu1 %v1343_v59 }
  0x84   :  { %776 = vmatpush1.bf16.msra.mxu0 %v1303_v30 }
  0x85   :  { %777 = vmatprep.subr.bf16.mxu0 %v1308_v31  ;;  %1166 = vmatpush3.bf16.msra.mxu1 %v1344_v60 }
  0x86   :  { %1167 = vmatprep.subr.bf16.mxu1 %v1345_v61 }
  0x88   :  { %778 = vmatpush2.bf16.msra.mxu0 %v1306_v32 }
  0x89   :  { %779 = vmatprep.subr.bf16.mxu0 %v1311_v33  ;;  %1168 = vmatpush3.bf16.msra.mxu1 %v1346_v62 }
  0x8a   :  { %1169 = vmatprep.subr.bf16.mxu1 %v1347_v63 }
  0x8c   :  { %780 = vmatpush2.bf16.msra.mxu0 %v1309_v34 }
  0x8d   :  { %781 = vmatprep.subr.bf16.mxu0 %v1314_v35  ;;  %1170 = vmatpush3.bf16.msra.mxu1 %v1348_v0 }
  0x90   :  { %782 = vmatpush2.bf16.msra.mxu0 %v1312_v36 }
  0x91   :  { %783 = vmatprep.subr.bf16.mxu0 %v1317_v37  ;;  %v1138_v37 = vld [vmem:[%s1497_s4] ss:$0 sm:$0xff] }
  0x94   :  { %784 = vmatpush2.bf16.msra.mxu0 %v1315_v38 }
  0x95   :  { %785 = vmatprep.subr.bf16.mxu0 %v1320_v39 }
  0x98   :  { %786 = vmatpush2.bf16.msra.mxu0 %v1318_v40 }
  0x99   :  { %787 = vmatprep.subr.bf16.mxu0 %v1323_v41 }
  0x9c   :  { %788 = vmatpush2.bf16.msra.mxu0 %v1321_v42 }
  0x9d   :  { %789 = vmatprep.subr.bf16.mxu0 %v1326_v43 }
  0xa0   :  { %790 = vmatpush2.bf16.msra.mxu0 %v1324_v44 }
  0xa1   :  { %791 = vmatprep.subr.bf16.mxu0 %v1332_v45 }
  0xa4   :  { %792 = vmatpush2.bf16.msra.mxu0 %v1330_v46 }
  0xa7   :  { %794 = vmatmul.mubr.bf16.vlgmr.msra.gmra.mxu0 %v72_v48 }
 0x127   :  { %v713_v1 = vpop.f32.mrf.mxu0 }
 0x128   :  { %v754_v3 = vpop.f32.mrf.mxu1  ;;  %v714_v20 = vadd.f32 %v713_v1, %v178_v18 }
 0x129   :  { %v715_v2 = vpop.f32.mrf.mxu0 }
 0x12a   :  { %v756_v5 = vpop.f32.mrf.mxu1  ;;  %v716_v21 = vadd.f32 %v715_v2, %v182_v19  ;;  %v755_v22 = vadd.f32 %v754_v3, %v714_v20 }
 0x12b   :  { %v717_v4 = vpop.f32.mrf.mxu0 }
 0x12c   :  { %v758_v7 = vpop.f32.mrf.mxu1  ;;  %v757_v24 = vadd.f32 %v756_v5, %v716_v21 }
 0x12d   :  { %v718_v6 = vpop.f32.mrf.mxu0 }
 0x12e   :  { %v759_v8 = vpop.f32.mrf.mxu1 }
 0x130   :  { %v836_v9 = vpop.f32.mrf.mxu1 }
 0x132   :  { %v838_v10 = vpop.f32.mrf.mxu1 }
 0x134   :  { %v840_v11 = vpop.f32.mrf.mxu1 }
 0x136   :  { %v841_v12 = vpop.f32.mrf.mxu1 }
 0x167   :  { %v795_v23 = vpop.f32.mrf.mxu0 }
 0x168   :  { %v796_v25 = vadd.f32 %v795_v23, %v755_v22 }
 0x169   :  { %v797_v26 = vpop.f32.mrf.mxu0 }
 0x16a   :  { %v837_v27 = vadd.f32 %v836_v9, %v796_v25  ;;  %v798_v28 = vadd.f32 %v797_v26, %v757_v24 }
 0x16b   :  { %v799_v29 = vpop.f32.mrf.mxu0 }
 0x16c   :  { %v839_v30 = vadd.f32 %v838_v10, %v798_v28  ;;  %v843_v31 = vmax.f32 %v837_v27, 0.0 }
 0x16d   :  { %v800_v32 = vpop.f32.mrf.mxu0 }
 0x16e   :  { %v844_v33 = vmax.f32 %v839_v30, 0.0  ;;  %v845_v35 = vpack.c.bf16 %v843_v31, %v843_v31 }
 0x170   :  { %v846_v34 = vpack.c.bf16 %v844_v33, %v844_v33 }
 0x172   :  { %1014 = vmatprep.mubr.bf16.mxu1 %v846_v34 }
 0x173   :  { %1015 = vmatmul.mubr.bf16.vlgmr.msra.gmra.mxu1 %v845_v35 }
 0x233   :  { %v1171_v36 = vpop.f32.mrf.mxu1 }
 0x235   :  { %v1172_v38 = vpop.f32.mrf.mxu1 }
 0x236   :  { %v1173_v39 = vadd.f32 %v1172_v38, %v1171_v36 }
 0x237   :  { %v1174_v40 = vpop.f32.mrf.mxu1 }
 0x238   :  { %v1017_v41 = vadd.f32 %v1173_v39, %v1138_v37 }
 0x239   :  { %v1175_v42 = vpop.f32.mrf.mxu1 }
 0x23a   :  { %1022 = vst [vmem:[#allocation8] sm:$0xff] %v1017_v41 }
 0x23b   :  { %1420 = shalt.err (!%p1417_p5)
}
 0x23c   :  { %1032 = dma.vmem_to_hbm [thread:$0]  %s1030_s13, 128, %s1498_s5, [#allocation4]  }
 0x23d   :  { %1433 = dma.done.wait [#allocation4], 128  }
 0x23e   :  { %1434 = vsyncadd [#allocation4], 4294967168 }
 0x23f   :  { %1036 = vsyncpa [#allocation3], 1 }
 0x240   :  { %1037 = vsyncpa [#allocation6], 1 }
 0x241   :  { %1038 = vsyncpa [#allocation4], 1 }

</bundles_post_ra>
